<compile_context>
chip_gen: v6e
topology: v6e:2x2x1
jax: 0.10.0
libtpu: 0.0.40
codegen_flags: <defaults>
</compile_context>

<pallas_src>
import functools

import jax
import jax.numpy as jnp
from jax.experimental import pallas as pl
from jax.experimental.pallas import tpu as pltpu


def _round_up(x, m):
    return ((x + m - 1) // m) * m


def _mlp_kernel(*refs):
    """refs = (x_ref, w0, b0, w1, b1, ..., w_{L-1}, b_{L-1}, out_ref)."""
    x_ref = refs[0]
    out_ref = refs[-1]
    wb_refs = refs[1:-1]
    n_layers = len(wb_refs) // 2

    # First matmul consumes the streamed activations directly (bf16 on MXU).
    h = x_ref[...]
    for layer in range(n_layers):
        w_ref = wb_refs[2 * layer]          # [d_in_p, d_out_p], bf16 (or f32)
        b_ref = wb_refs[2 * layer + 1]      # [1, d_out_p], f32
        # MXU matmul: bf16 inputs, f32 accumulation.
        h = jnp.dot(h.astype(w_ref.dtype), w_ref[...],
                    preferred_element_type=jnp.float32)
        h = h + b_ref[...].astype(jnp.float32)   # VPU, f32
        if layer < n_layers - 1:                 # last Tanh was popped in build()
            h = jnp.tanh(h)                      # EUP transcendental, f32
    out_ref[...] = h.astype(out_ref.dtype)


def pack_params(weights, biases, mxu_dtype=jnp.bfloat16):
    """Zero-pad every layer to 128-lane multiples; weights stored in mxu_dtype.

    Padding is exact: padded input columns of x are zero, padded weight
    rows/cols are zero and padded bias entries are zero, so the valid
    [:, :d_out] slice of the result is bit-for-bit the unpadded computation
    (up to the bf16 input rounding of the matmuls).
    """
    packed_w, packed_b = [], []
    for w, b in zip(weights, biases):
        d_in, d_out = w.shape
        d_in_p, d_out_p = _round_up(d_in, 128), _round_up(d_out, 128)
        w_p = jnp.zeros((d_in_p, d_out_p), jnp.float32).at[:d_in, :d_out].set(w)
        b_p = jnp.zeros((1, d_out_p), jnp.float32).at[0, :d_out].set(b)
        packed_w.append(w_p.astype(mxu_dtype))
        packed_b.append(b_p)
    return packed_w, packed_b


@functools.partial(jax.jit, static_argnames=("tile_n", "mxu_dtype"))
def mlp_forward(x, weights, biases, *, tile_n=512, mxu_dtype=jnp.bfloat16):
    """Fused MLP forward: x [N, D_in] -> [N, D_out] (f32)."""
    assert len(weights) == len(biases)
    n, d_in = x.shape
    d_out = weights[-1].shape[1]

    packed_w, packed_b = pack_params(weights, biases, mxu_dtype=mxu_dtype)
    d_in_p = packed_w[0].shape[0]
    d_out_p = packed_w[-1].shape[1]

    # Batch tiling: pick a lane/VMEM-friendly tile and pad N up to a multiple.
    tile_n = min(tile_n, _round_up(n, 8))
    n_p = _round_up(n, tile_n)
    # Stream x to the kernel in the MXU dtype (halves DMA bytes for the only
    # batch-tiled input); padding rows/cols are zero.
    x_p = jnp.zeros((n_p, d_in_p), jnp.float32).at[:n, :d_in].set(
        x.astype(jnp.float32)).astype(mxu_dtype)

    operands = [x_p]
    in_specs = [pl.BlockSpec((tile_n, d_in_p), lambda i: (i, 0))]
    for w_p, b_p in zip(packed_w, packed_b):
        operands += [w_p, b_p]
        # Constant index_maps -> weights/biases stay resident across grid steps.
        in_specs += [
            pl.BlockSpec(w_p.shape, lambda i: (0, 0)),
            pl.BlockSpec(b_p.shape, lambda i: (0, 0)),
        ]
    out_spec = pl.BlockSpec((tile_n, d_out_p), lambda i: (i, 0))

    flops = sum(2 * n_p * w.shape[0] * w.shape[1] for w in packed_w)
    transcendentals = n_p * sum(w.shape[1] for w in packed_w[:-1])
    bytes_accessed = (int(x_p.size) * x_p.dtype.itemsize
                      + sum(int(w.size) * w.dtype.itemsize for w in packed_w)
                      + sum(int(b.size) * 4 for b in packed_b)
                      + n_p * d_out_p * 4)

    out_p = pl.pallas_call(
        _mlp_kernel,
        out_shape=jax.ShapeDtypeStruct((n_p, d_out_p), jnp.float32),
        grid=(pl.cdiv(n_p, tile_n),),
        in_specs=in_specs,
        out_specs=out_spec,
        compiler_params=pltpu.CompilerParams(
            dimension_semantics=("parallel",)),   # megacore on v7x
        cost_estimate=pl.CostEstimate(
            flops=int(flops),
            transcendentals=int(transcendentals),
            bytes_accessed=int(bytes_accessed)),
    )(*operands)

    # Lane-dense kernel output -> slice back to the true shape in the wrapper.
    return out_p[:n, :d_out]


def mlp_reference(x, weights, biases, mxu_dtype=jnp.float32):
    """Pure-JAX reference with the same matmul-input dtype as the kernel."""
    h = x.astype(jnp.float32)
    for i, (w, b) in enumerate(zip(weights, biases)):
        h = jnp.dot(h.astype(mxu_dtype), w.astype(mxu_dtype),
                    preferred_element_type=jnp.float32) + b.astype(jnp.float32)
        if i < len(weights) - 1:
            h = jnp.tanh(h)
    return h


def init_params(key, layer_sizes, init_scale=1.0):
    """Deterministic init mirroring build(): weight ~ N(0, init_scale),
    bias ~ U(-1/sqrt(fan_in), 1/sqrt(fan_in)) (PyTorch Linear default)."""
    weights, biases = [], []
    for d_in, d_out in zip(layer_sizes[:-1], layer_sizes[1:]):
        key, kw, kb = jax.random.split(key, 3)
        w = init_scale * jax.random.normal(kw, (d_in, d_out), dtype=jnp.float32)
        bound = 1.0 / jnp.sqrt(jnp.float32(d_in))
        b = jax.random.uniform(kb, (d_out,), minval=-bound, maxval=bound,
                               dtype=jnp.float32)
        weights.append(w)
        biases.append(b)
    return weights, biases


if __name__ == "__main__":
    key = jax.random.PRNGKey(0)

    # Small shapes consistent with the module: X is [N, in_dim] feature matrix,
    # hidden_layer_sizes=(32, 32), binary classifier -> out_dim = 1.
    batch, in_dim, out_dim = 8, 16, 1
    hidden_layer_sizes = (32, 32)
    layer_sizes = [in_dim] + list(hidden_layer_sizes) + [out_dim]

    key, kx = jax.random.split(key)
    x = jax.random.normal(kx, (batch, in_dim), dtype=jnp.float32)

    weights, biases = init_params(key, layer_sizes, init_scale=1.0)

    out = mlp_forward(x, weights, biases)
    out = jax.block_until_ready(out)
    assert out.shape == (batch, out_dim)

    # Tight check against a reference that applies the same bf16 MXU-input cast.
    ref_bf16 = mlp_reference(x, weights, biases, mxu_dtype=jnp.bfloat16)
    assert jnp.allclose(out, ref_bf16, atol=2e-3, rtol=2e-3)

    # Looser sanity check against the full-f32 PyTorch-equivalent forward.
    ref_f32 = mlp_reference(x, weights, biases, mxu_dtype=jnp.float32)
    assert jnp.allclose(out, ref_f32, atol=1e-1, rtol=1e-1)

    # TODO(synk): fit()/predict() (SGD training loop, MSE loss, threshold/argmax
    # host logic) are driver code, not Module compute; only forward() is a kernel.
    print("KERNEL_OK")
</pallas_src>

<mosaic_0001>
module attributes {stable_mosaic.version = 11 : i64} {
  func.func @_mlp_kernel(%arg0: i32, %arg1: memref<8x128xbf16, #tpu.memory_space<vmem>>, %arg2: memref<128x128xbf16, #tpu.memory_space<vmem>>, %arg3: memref<1x128xf32, #tpu.memory_space<vmem>>, %arg4: memref<128x128xbf16, #tpu.memory_space<vmem>>, %arg5: memref<1x128xf32, #tpu.memory_space<vmem>>, %arg6: memref<128x128xbf16, #tpu.memory_space<vmem>>, %arg7: memref<1x128xf32, #tpu.memory_space<vmem>>, %arg8: memref<8x128xf32, #tpu.memory_space<vmem>>) attributes {dimension_semantics = [#tpu.dimension_semantics<parallel>], iteration_bounds = array<i64: 1>, scalar_prefetch = 0 : i64, scratch_operands = 0 : i64, tpu.core_type = #tpu.core_type<tc>, window_params = [{transform_indices = @transform_0, window_bounds = array<i64: 8, 128>}, {pipeline_mode = #tpu.pipeline_mode<synchronous>, transform_indices = @transform_1, window_bounds = array<i64: 128, 128>}, {pipeline_mode = #tpu.pipeline_mode<synchronous>, transform_indices = @transform_2, window_bounds = array<i64: 1, 128>}, {pipeline_mode = #tpu.pipeline_mode<synchronous>, transform_indices = @transform_3, window_bounds = array<i64: 128, 128>}, {pipeline_mode = #tpu.pipeline_mode<synchronous>, transform_indices = @transform_4, window_bounds = array<i64: 1, 128>}, {pipeline_mode = #tpu.pipeline_mode<synchronous>, transform_indices = @transform_5, window_bounds = array<i64: 128, 128>}, {pipeline_mode = #tpu.pipeline_mode<synchronous>, transform_indices = @transform_6, window_bounds = array<i64: 1, 128>}, {transform_indices = @transform_7, window_bounds = array<i64: 8, 128>}]} {
    %c0 = arith.constant 0 : index
    %c0_0 = arith.constant 0 : index
    %0 = vector.load %arg1[%c0, %c0_0] : memref<8x128xbf16, #tpu.memory_space<vmem>>, vector<8x128xbf16>
    %c0_1 = arith.constant 0 : index
    %c0_2 = arith.constant 0 : index
    %1 = vector.load %arg2[%c0_1, %c0_2] : memref<128x128xbf16, #tpu.memory_space<vmem>>, vector<128x128xbf16>
    %cst = arith.constant dense<0.000000e+00> : vector<8x128xf32>
    %2 = tpu.matmul %0, %1, %cst {dimension_numbers = #tpu.dot_dimension_numbers<[1], [0], [0], [1], [0, 0, 1, 1], [], []>} : vector<8x128xbf16>, vector<128x128xbf16>, vector<8x128xf32> -> vector<8x128xf32>
    %c0_3 = arith.constant 0 : index
    %c0_4 = arith.constant 0 : index
    %3 = vector.load %arg3[%c0_3, %c0_4] : memref<1x128xf32, #tpu.memory_space<vmem>>, vector<1x128xf32>
    %4 = vector.broadcast %3 : vector<1x128xf32> to vector<8x128xf32>
    %5 = arith.addf %2, %4 : vector<8x128xf32>
    %6 = math.tanh %5 : vector<8x128xf32>
    %7 = arith.truncf %6 : vector<8x128xf32> to vector<8x128xbf16>
    %c0_5 = arith.constant 0 : index
    %c0_6 = arith.constant 0 : index
    %8 = vector.load %arg4[%c0_5, %c0_6] : memref<128x128xbf16, #tpu.memory_space<vmem>>, vector<128x128xbf16>
    %cst_7 = arith.constant dense<0.000000e+00> : vector<8x128xf32>
    %9 = tpu.matmul %7, %8, %cst_7 {dimension_numbers = #tpu.dot_dimension_numbers<[1], [0], [0], [1], [0, 0, 1, 1], [], []>} : vector<8x128xbf16>, vector<128x128xbf16>, vector<8x128xf32> -> vector<8x128xf32>
    %c0_8 = arith.constant 0 : index
    %c0_9 = arith.constant 0 : index
    %10 = vector.load %arg5[%c0_8, %c0_9] : memref<1x128xf32, #tpu.memory_space<vmem>>, vector<1x128xf32>
    %11 = vector.broadcast %10 : vector<1x128xf32> to vector<8x128xf32>
    %12 = arith.addf %9, %11 : vector<8x128xf32>
    %13 = math.tanh %12 : vector<8x128xf32>
    %14 = arith.truncf %13 : vector<8x128xf32> to vector<8x128xbf16>
    %c0_10 = arith.constant 0 : index
    %c0_11 = arith.constant 0 : index
    %15 = vector.load %arg6[%c0_10, %c0_11] : memref<128x128xbf16, #tpu.memory_space<vmem>>, vector<128x128xbf16>
    %cst_12 = arith.constant dense<0.000000e+00> : vector<8x128xf32>
    %16 = tpu.matmul %14, %15, %cst_12 {dimension_numbers = #tpu.dot_dimension_numbers<[1], [0], [0], [1], [0, 0, 1, 1], [], []>} : vector<8x128xbf16>, vector<128x128xbf16>, vector<8x128xf32> -> vector<8x128xf32>
    %c0_13 = arith.constant 0 : index
    %c0_14 = arith.constant 0 : index
    %17 = vector.load %arg7[%c0_13, %c0_14] : memref<1x128xf32, #tpu.memory_space<vmem>>, vector<1x128xf32>
    %18 = vector.broadcast %17 : vector<1x128xf32> to vector<8x128xf32>
    %19 = arith.addf %16, %18 : vector<8x128xf32>
    %c0_15 = arith.constant 0 : index
    %c0_16 = arith.constant 0 : index
    %20 = vector.load %arg8[%c0_15, %c0_16] : memref<8x128xf32, #tpu.memory_space<vmem>>, vector<8x128xf32>
    tpu.vector_store %arg8[%c0_15, %c0_16], %19 {strides = array<i32>} : memref<8x128xf32, #tpu.memory_space<vmem>>, vector<8x128xf32>,
    return
  }
  func.func @transform_0(%arg0: i32) -> (i32, i32) {
    %c0_i32 = arith.constant 0 : i32
    %c0_i32_0 = arith.constant 0 : i32
    return %arg0, %c0_i32 : i32, i32
  }
  func.func @transform_1(%arg0: i32) -> (i32, i32) {
    %c0_i32 = arith.constant 0 : i32
    %c0_i32_0 = arith.constant 0 : i32
    %c0_i32_1 = arith.constant 0 : i32
    return %c0_i32, %c0_i32_0 : i32, i32
  }
  func.func @transform_2(%arg0: i32) -> (i32, i32) {
    %c0_i32 = arith.constant 0 : i32
    %c0_i32_0 = arith.constant 0 : i32
    %c0_i32_1 = arith.constant 0 : i32
    return %c0_i32, %c0_i32_0 : i32, i32
  }
  func.func @transform_3(%arg0: i32) -> (i32, i32) {
    %c0_i32 = arith.constant 0 : i32
    %c0_i32_0 = arith.constant 0 : i32
    %c0_i32_1 = arith.constant 0 : i32
    return %c0_i32, %c0_i32_0 : i32, i32
  }
  func.func @transform_4(%arg0: i32) -> (i32, i32) {
    %c0_i32 = arith.constant 0 : i32
    %c0_i32_0 = arith.constant 0 : i32
    %c0_i32_1 = arith.constant 0 : i32
    return %c0_i32, %c0_i32_0 : i32, i32
  }
  func.func @transform_5(%arg0: i32) -> (i32, i32) {
    %c0_i32 = arith.constant 0 : i32
    %c0_i32_0 = arith.constant 0 : i32
    %c0_i32_1 = arith.constant 0 : i32
    return %c0_i32, %c0_i32_0 : i32, i32
  }
  func.func @transform_6(%arg0: i32) -> (i32, i32) {
    %c0_i32 = arith.constant 0 : i32
    %c0_i32_0 = arith.constant 0 : i32
    %c0_i32_1 = arith.constant 0 : i32
    return %c0_i32, %c0_i32_0 : i32, i32
  }
  func.func @transform_7(%arg0: i32) -> (i32, i32) {
    %c0_i32 = arith.constant 0 : i32
    %c0_i32_0 = arith.constant 0 : i32
    return %arg0, %c0_i32 : i32, i32
  }
}

</mosaic_0001>

<bundles_post_ra>
// kernel: mlp_forward.1
= control target key start
LH: loop header
LB: loop body
LE: loop exit
PB: predicated region body
PF: predicated region fallthrough
CT: control target
= control target key end

     0   :  { %v514_v0 = vmov 0.0   ;;  %vm515_vm0 = vmmov 0   ;;  %s673_s1 = inlined_call_operand.vmem [shape: bf16[128,128], index: 1, kind: input, shape index: {}]   ;;  %s674_s3 = inlined_call_operand.vmem [shape: bf16[128,128], index: 3, kind: input, shape index: {}]   ;;  %s675_s0 = inlined_call_operand.vmem [shape: bf16[8,128], index: 0, kind: input, shape index: {}]   ;;  %s676_s5 = inlined_call_operand.vmem [shape: bf16[128,128], index: 5, kind: input, shape index: {}]   ;;  %s677_s2 = inlined_call_operand.vmem [shape: f32[1,128], index: 2, kind: input, shape index: {}]   ;;  %s678_s4 = inlined_call_operand.vmem [shape: f32[1,128], index: 4, kind: input, shape index: {}]   ;;  %s679_s6 = inlined_call_operand.vmem [shape: f32[1,128], index: 6, kind: input, shape index: {}]   ;;  %s680_s7 = inlined_call_operand.vmem [shape: f32[8,128], index: 7, kind: output, shape index: {}]  }
   0x1   :  { %424 = vmatprep.subr.bf16.mxu0 %v514_v0  ;;  %v486_v1 = vld [vmem:[%s673_s1 + $0x38] sm:$0xff]   ;;  %440 = vmatprep.mubr.msk.bf16.mxu0 %vm515_vm0, %v514_v0  ;;  %v487_v2 = vld [vmem:[%s673_s1 + $0x30] sm:$0xff]   ;;  %v488_v3 = vld [vmem:[%s673_s1 + $0x28] sm:$0xff]  }
   0x2   :  { %444 = vmatprep.subr.bf16.mxu1 %v514_v0  ;;  %460 = vmatprep.mubr.msk.bf16.mxu1 %vm515_vm0, %v514_v0  ;;  %v494_v4 = vld [vmem:[%s674_s3 + $0x38] sm:$0xff]   ;;  %v489_v5 = vld [vmem:[%s673_s1 + $0x20] sm:$0xff]   ;;  %v495_v6 = vld [vmem:[%s674_s3 + $0x30] sm:$0xff]  }
   0x3   :  { %425 = vmatpush3.bf16.msra.mxu0 %v486_v1  ;;  %445 = vmatpush3.bf16.msra.mxu1 %v494_v4  ;;  %v490_v7 = vld [vmem:[%s673_s1 + $0x18] sm:$0xff]   ;;  %v496_v8 = vld [vmem:[%s674_s3 + $0x28] sm:$0xff]   ;;  %v491_v9 = vld [vmem:[%s673_s1 + $0x10] sm:$0xff]  }
   0x4   :  { %426 = vmatprep.subr.bf16.mxu0 %v514_v0  ;;  %446 = vmatprep.subr.bf16.mxu1 %v514_v0  ;;  %v492_v10 = vld [vmem:[%s673_s1 + $0x8] sm:$0xff]   ;;  %v493_v11 = vld [vmem:[%s673_s1] sm:$0xff]   ;;  %v498_v14 = vld [vmem:[%s674_s3 + $0x18] sm:$0xff]  }
   0x5   :  { %v27_v12 = vld [vmem:[%s675_s0] sm:$0xf]  ;;  %v499_v15 = vld [vmem:[%s674_s3 + $0x10] sm:$0xff]   ;;  %v500_v16 = vld [vmem:[%s674_s3 + $0x8] sm:$0xff]  }
   0x6   :  { %v497_v13 = vld [vmem:[%s674_s3 + $0x20] sm:$0xff]   ;;  %v502_v18 = vld [vmem:[%s676_s5 + $0x38] sm:$0xff]   ;;  %v503_v19 = vld [vmem:[%s676_s5 + $0x30] sm:$0xff]  }
   0x7   :  { %427 = vmatpush3.bf16.msra.mxu0 %v487_v2  ;;  %447 = vmatpush3.bf16.msra.mxu1 %v495_v6  ;;  %v501_v17 = vld [vmem:[%s674_s3] sm:$0xff]   ;;  %v504_v20 = vld [vmem:[%s676_s5 + $0x28] sm:$0xff]   ;;  %v506_v30 = vld [vmem:[%s676_s5 + $0x18] sm:$0xff]  }
   0x8   :  { %428 = vmatprep.subr.bf16.mxu0 %v514_v0  ;;  %448 = vmatprep.subr.bf16.mxu1 %v514_v0  ;;  %v370_v21 = vld [vmem:[%s677_s2] ss:$0 sm:$0xff]  ;;  %v507_v31 = vld [vmem:[%s676_s5 + $0x10] sm:$0xff]   ;;  %v508_v32 = vld [vmem:[%s676_s5 + $0x8] sm:$0xff]  }
   0x9   :  { %v505_v29 = vld [vmem:[%s676_s5 + $0x20] sm:$0xff]  }
   0xa   :  { %v509_v33 = vld [vmem:[%s676_s5] sm:$0xff]  }
   0xb   :  { %429 = vmatpush3.bf16.msra.mxu0 %v488_v3  ;;  %449 = vmatpush3.bf16.msra.mxu1 %v496_v8  ;;  %v379_v34 = vld [vmem:[%s678_s4] ss:$0 sm:$0xff] }
   0xc   :  { %430 = vmatprep.subr.bf16.mxu0 %v514_v0  ;;  %450 = vmatprep.subr.bf16.mxu1 %v514_v0  ;;  %v388_v42 = vld [vmem:[%s679_s6] ss:$0 sm:$0xff] }
   0xf   :  { %431 = vmatpush3.bf16.msra.mxu0 %v489_v5  ;;  %451 = vmatpush3.bf16.msra.mxu1 %v497_v13 }
  0x10   :  { %432 = vmatprep.subr.bf16.mxu0 %v514_v0  ;;  %452 = vmatprep.subr.bf16.mxu1 %v514_v0 }
  0x13   :  { %433 = vmatpush3.bf16.msra.mxu0 %v490_v7  ;;  %453 = vmatpush3.bf16.msra.mxu1 %v498_v14 }
  0x14   :  { %434 = vmatprep.subr.bf16.mxu0 %v514_v0  ;;  %454 = vmatprep.subr.bf16.mxu1 %v514_v0 }
  0x17   :  { %435 = vmatpush3.bf16.msra.mxu0 %v491_v9  ;;  %455 = vmatpush3.bf16.msra.mxu1 %v499_v15 }
  0x18   :  { %436 = vmatprep.subr.bf16.mxu0 %v514_v0  ;;  %456 = vmatprep.subr.bf16.mxu1 %v514_v0 }
  0x1b   :  { %437 = vmatpush3.bf16.msra.mxu0 %v492_v10  ;;  %457 = vmatpush3.bf16.msra.mxu1 %v500_v16 }
  0x1c   :  { %438 = vmatprep.subr.bf16.mxu0 %v514_v0  ;;  %458 = vmatprep.subr.bf16.mxu1 %v514_v0 }
  0x1f   :  { %439 = vmatpush3.bf16.msra.mxu0 %v493_v11  ;;  %459 = vmatpush3.bf16.msra.mxu1 %v501_v17 }
  0x20   :  { %464 = vmatprep.subr.bf16.mxu0 %v514_v0 }
  0x22   :  { %441 = vmatmul.mubr.bf16.vlgmr.msra.gmra.mxu0 %v27_v12 }
  0x23   :  { %480 = vmatprep.mubr.msk.bf16.mxu0 %vm515_vm0, %v514_v0  ;;  %465 = vmatpush3.bf16.msra.mxu0 %v502_v18 }
  0x24   :  { %466 = vmatprep.subr.bf16.mxu0 %v514_v0 }
  0x27   :  { %467 = vmatpush3.bf16.msra.mxu0 %v503_v19 }
  0x28   :  { %468 = vmatprep.subr.bf16.mxu0 %v514_v0 }
  0x2b   :  { %469 = vmatpush3.bf16.msra.mxu0 %v504_v20 }
  0x2c   :  { %470 = vmatprep.subr.bf16.mxu0 %v514_v0 }
  0x2f   :  { %471 = vmatpush3.bf16.msra.mxu0 %v505_v29 }
  0x30   :  { %472 = vmatprep.subr.bf16.mxu0 %v514_v0 }
  0x33   :  { %473 = vmatpush3.bf16.msra.mxu0 %v506_v30 }
  0x34   :  { %474 = vmatprep.subr.bf16.mxu0 %v514_v0 }
  0x37   :  { %475 = vmatpush3.bf16.msra.mxu0 %v507_v31 }
  0x38   :  { %476 = vmatprep.subr.bf16.mxu0 %v514_v0 }
  0x3b   :  { %477 = vmatpush3.bf16.msra.mxu0 %v508_v32 }
  0x3c   :  { %478 = vmatprep.subr.bf16.mxu0 %v514_v0 }
  0x3f   :  { %479 = vmatpush3.bf16.msra.mxu0 %v509_v33 }
  0xe2   :  { %v133_v22 = vpop.f32.mrf.mxu0 }
  0xe3   :  { %v134_v23 = vadd.f32 %v370_v21, %v133_v22 }
  0xe4   :  { %v442_v24 = vpop.f32.mrf.mxu0 }
  0xe5   :  { %510 = vtanh.f32 %v134_v23 }
  0xe6   :  { %v136_v25 = vpop.f32.mrf.mxu0 }
  0xe8   :  { %v443_v26 = vpop.f32.mrf.mxu0 }
  0xf2   :  { %v511_v27 = vpop.eup %510 }
  0xf3   :  { %v140_v28 = vpack.c.bf16 %v511_v27, %v511_v27 }
  0xf5   :  { %461 = vmatmul.mubr.bf16.vlgmr.msra.gmra.mxu1 %v140_v28 }
 0x1b5   :  { %v246_v35 = vpop.f32.mrf.mxu1 }
 0x1b6   :  { %v247_v36 = vadd.f32 %v379_v34, %v246_v35 }
 0x1b7   :  { %v462_v37 = vpop.f32.mrf.mxu1 }
 0x1b8   :  { %512 = vtanh.f32 %v247_v36 }
 0x1b9   :  { %v249_v38 = vpop.f32.mrf.mxu1 }
 0x1bb   :  { %v463_v39 = vpop.f32.mrf.mxu1 }
 0x1c5   :  { %v513_v40 = vpop.eup %512 }
 0x1c6   :  { %v253_v41 = vpack.c.bf16 %v513_v40, %v513_v40 }
 0x1c8   :  { %481 = vmatmul.mubr.bf16.vlgmr.msra.gmra.mxu0 %v253_v41 }
 0x288   :  { %v359_v43 = vpop.f32.mrf.mxu0 }
 0x289   :  { %v360_v44 = vadd.f32 %v388_v42, %v359_v43 }
 0x28a   :  { %v482_v45 = vpop.f32.mrf.mxu0 }
 0x28b   :  { %365 = vst [vmem:[%s680_s7] sm:$0xff] %v360_v44 }
 0x28c   :  { %v362_v46 = vpop.f32.mrf.mxu0 }
 0x28e   :  { %v483_v47 = vpop.f32.mrf.mxu0 }

</bundles_post_ra>
